<compile_context>
chip_gen: v5e
topology: v5e:2x2
jax: 0.10.0
libtpu: 0.0.40
codegen_flags: <defaults>
</compile_context>

<pallas_src>
import jax
import jax.numpy as jnp
from jax.experimental import pallas as pl
from jax.experimental.pallas import tpu as pltpu


def _view_copy_kernel(x_ref, o_ref):
    # The flatten is already expressed by the wrapper reshape / BlockSpecs;
    # the kernel just materializes the (rows, D) block lane-densely.
    o_ref[...] = x_ref[...]


def view_block_forward(x, shape=-1):
    """Equivalent of ViewBlock.forward: x.view(x.size(0), shape)."""
    n = x.shape[0]
    # TODO(synk): torch .view is a metadata-only aliasing op with no compute;
    # the reshape below is a free row-major metadata reshape in XLA (exactly
    # matching .view on a contiguous tensor).  The Pallas kernel's only job is
    # the materializing, lane-dense copy of the flattened tensor.
    x2 = jnp.reshape(x, (n, -1) if shape == -1 else (n, shape))
    n, d = x2.shape

    # Row-band tiling: a single grid step at these shapes; for large batches
    # use bands that are multiples of 8 rows so blocks stay (8,128)-aligned
    # and comfortably inside VMEM (double-buffered) on v5e/v6e/v7x.
    bytes_per_row = d * x2.dtype.itemsize
    vmem_budget = 4 * 1024 * 1024  # per buffer; leaves pipelining headroom
    rows_fit = max(1, vmem_budget // max(1, bytes_per_row))
    if n <= rows_fit:
        block_n = n                       # whole batch in one block
    else:
        block_n = max(8, (rows_fit // 8) * 8)
    grid_n = pl.cdiv(n, block_n)

    return pl.pallas_call(
        _view_copy_kernel,
        out_shape=jax.ShapeDtypeStruct((n, d), x2.dtype),
        grid_spec=pltpu.PrefetchScalarGridSpec(
            num_scalar_prefetch=0,
            grid=(grid_n,),
            in_specs=[pl.BlockSpec((block_n, d), lambda i: (i, 0))],
            out_specs=pl.BlockSpec((block_n, d), lambda i: (i, 0)),
        ),
        compiler_params=pltpu.CompilerParams(
            dimension_semantics=("parallel",),
        ),
    )(x2)


if __name__ == "__main__":
    # ViewBlock(dim=[4, 16, 16]) with default shape=-1 applied to a
    # (2, 4, 16, 16) activation -> (2, 1024).
    N, C, H, W = 2, 4, 16, 16
    key = jax.random.PRNGKey(0)
    x = jax.random.normal(key, (N, C, H, W), jnp.float32)

    out = view_block_forward(x, shape=-1)
    out = jax.block_until_ready(out)

    ref = x.reshape(N, C * H * W)
    assert out.shape == (N, C * H * W), out.shape
    assert jnp.array_equal(out, ref), float(jnp.max(jnp.abs(out - ref)))

    print("KERNEL_OK")
</pallas_src>

<mosaic_0001>
module attributes {stable_mosaic.version = 11 : i64} {
  func.func @_view_copy_kernel(%arg0: i32, %arg1: memref<2x1024xf32, #tpu.memory_space<vmem>>, %arg2: memref<2x1024xf32, #tpu.memory_space<vmem>>) attributes {dimension_semantics = [#tpu.dimension_semantics<parallel>], iteration_bounds = array<i64: 1>, scalar_prefetch = 0 : i64, scratch_operands = 0 : i64, tpu.core_type = #tpu.core_type<tc>, window_params = [{transform_indices = @transform_0, window_bounds = array<i64: 2, 1024>}, {transform_indices = @transform_1, window_bounds = array<i64: 2, 1024>}]} {
    %c0 = arith.constant 0 : index
    %c0_0 = arith.constant 0 : index
    %0 = vector.load %arg1[%c0, %c0_0] : memref<2x1024xf32, #tpu.memory_space<vmem>>, vector<2x1024xf32>
    %c0_1 = arith.constant 0 : index
    %c0_2 = arith.constant 0 : index
    %1 = vector.load %arg2[%c0_1, %c0_2] : memref<2x1024xf32, #tpu.memory_space<vmem>>, vector<2x1024xf32>
    tpu.vector_store %arg2[%c0_1, %c0_2], %0 {strides = array<i32>} : memref<2x1024xf32, #tpu.memory_space<vmem>>, vector<2x1024xf32>,
    return
  }
  func.func @transform_0(%arg0: i32) -> (i32, i32) {
    %c0_i32 = arith.constant 0 : i32
    %c0_i32_0 = arith.constant 0 : i32
    return %arg0, %c0_i32 : i32, i32
  }
  func.func @transform_1(%arg0: i32) -> (i32, i32) {
    %c0_i32 = arith.constant 0 : i32
    %c0_i32_0 = arith.constant 0 : i32
    return %arg0, %c0_i32 : i32, i32
  }
}

</mosaic_0001>

<bundles_post_ra>
// kernel: tpu_custom_call.1
= control target key start
LH: loop header
LB: loop body
LE: loop exit
PB: predicated region body
PF: predicated region fallthrough
CT: control target
= control target key end

     0   :  { %6 = vsyncpa [#allocation3], 0  ;;  %s116_s0 = inlined_call_operand.hbm [shape: f32[2,1024], index: 0, kind: input, shape index: {}]   ;;  %s117_s1 = inlined_call_operand.hbm [shape: f32[2,1024], index: 1, kind: output, shape index: {}]  }
   0x1   :  { %7 = vsyncpa [#allocation4], 0  ;;  %s13_s8 = sshll.u32 %s116_s0, 4  ;;  %s98_s9 = smov [#allocation2]   ;;  %s14_s8 = int_to_ptr.hbm [resolvable:$true] %s13_s8 }
   0x2   :  { %s15_s10 = sshll.u32 %s98_s9, 4  ;;  %s16_s10 = int_to_ptr.vmem [resolvable:$true] %s15_s10 }
   0x3   :  { %18 = dma.hbm_to_vmem [thread:$0]  %s14_s8, 256, %s16_s10, [#allocation3]  }
   0x4   :  { %94 = dma.done.wait [#allocation3], 256  }
   0x5   :  { %95 = vsyncadd [#allocation3], 4294967040  ;;  %s99_s11 = smov [#allocation5]   ;;  %s34_s15 = sshll.u32 %s117_s1, 4  ;;  %v23_v0 = vld [vmem:[#allocation2] sm:$0xff]  ;;  %v24_v1 = vld [vmem:[#allocation2 + $0x8] sm:$0xff]  ;;  %s35_s15 = int_to_ptr.hbm [resolvable:$true] %s34_s15 }
   0x6   :  { %s32_s12 = sshll.u32 %s99_s11, 4  ;;  %25 = vst [vmem:[#allocation5] sm:$0xff] %v23_v0  ;;  %s33_s12 = int_to_ptr.vmem [resolvable:$true] %s32_s12 }
   0x7   :  { %26 = vst [vmem:[#allocation5 + $0x8] sm:$0xff] %v24_v1 }
   0x8   :  { %37 = dma.vmem_to_hbm [thread:$0]  %s33_s12, 256, %s35_s15, [#allocation4]  }
   0x9   :  { %96 = dma.done.wait [#allocation4], 256  }
   0xa   :  { %97 = vsyncadd [#allocation4], 4294967040 }
   0xb   :  { %42 = vsyncpa [#allocation3], 1 }
   0xc   :  { %43 = vsyncpa [#allocation4], 1 }

</bundles_post_ra>
